<compile_context>
chip_gen: v7x
topology: tpu7x:2x2x1
jax: 0.10.0
libtpu: 0.0.40
codegen_flags: <defaults>
</compile_context>

<pallas_src>
import functools

import jax
import jax.numpy as jnp
import numpy as np
from jax import lax
from jax.experimental import pallas as pl
from jax.experimental.pallas import tpu as pltpu


# ky (or kx) indices of the original 3x3 kernel that land on input offset d for output
# phase a (rows) / b (cols), after folding nearest-2x upsampling into the conv.
_KSET = {(0, -1): (0,), (0, 0): (1, 2), (1, 0): (0, 1), (1, 1): (2,)}
# which output phases use input offset d
_PHASES_OF = {-1: (0,), 0: (0, 1), 1: (1,)}


def _build_taps(w):
    """w: (Cout, Cin, 3, 3) f32 -> (meta, w_all).

    meta[t] = (di, dj, phases, row_offset) with phases = tuple of (a, b) sharing tap t.
    w_all   = (16*Cout, Cin): effective 2x2-conv weights of all taps/phases stacked along
              the output-channel dim (sliced by static row offsets inside the kernel).
    """
    Cout = w.shape[0]
    meta, blocks, off = [], [], 0
    for di in (-1, 0, 1):
        for dj in (-1, 0, 1):
            phases = tuple((a, b) for a in _PHASES_OF[di] for b in _PHASES_OF[dj])
            for (a, b) in phases:
                weff = w[:, :, list(_KSET[(a, di)]), :].sum(axis=2)   # (Co, Ci, 3)
                weff = weff[:, :, list(_KSET[(b, dj)])].sum(axis=2)   # (Co, Ci)
                blocks.append(weff)
            meta.append((di, dj, phases, off))
            off += len(phases) * Cout
    return meta, jnp.concatenate(blocks, axis=0)


def _plan_tiles(C, H, W, in_bytes, out_bytes):
    """Pick rows-per-tile TH and an explicit VMEM limit.

    TH = largest divisor of H whose per-step working set fits a conservative
    (v7x 64 MiB VMEM) budget, whose lane tile TH*W is a multiple of 128 (or the full
    image), preferring >= 2 row tiles so both v7x TensorCores get work even at batch=1.
    """
    budget = 24 << 20

    def working_set(th):
        lt = th * W
        return (2 * C * lt * in_bytes              # input tile (double-buffered)
                + 4 * C * W * in_bytes             # row halos (double-buffered)
                + 2 * 4 * C * lt * out_bytes       # 4-phase output (double-buffered)
                + 2 * 16 * C * C * in_bytes        # stacked tap weights
                + C * (lt + 2 * W + 2) * in_bytes  # padded scratch slab
                + 4 * C * lt * 4)                  # f32 phase accumulators

    cands = [d for d in range(H, 0, -1)
             if H % d == 0 and ((d * W) % 128 == 0 or d == H)]
    fitting = [d for d in cands if working_set(d) <= budget]
    pool = fitting or [cands[-1]]
    multi = [d for d in pool if H // d >= 2]
    th = (multi or pool)[0]
    limit = int(min(max(2 * working_set(th) + (2 << 20), 16 << 20), 100 << 20))
    return th, limit


def _make_conv_kernel(C, W, TH, meta, cdt):
    LT = TH * W
    OFF = W + 1          # slab offset so every tap shift is an in-bounds static slice

    def kernel(x_ref, above_ref, below_ref, w_ref, b_ref, o_ref, xpad_ref):
        # --- zero-padded [above row | TH-row tile | below row] slab in VMEM ----------
        zcol = jnp.zeros((C, 1), cdt)
        xpad_ref[:, 0:1] = zcol
        xpad_ref[:, 1:1 + W] = above_ref[...]
        xpad_ref[:, OFF:OFF + LT] = x_ref[...]
        xpad_ref[:, OFF + LT:OFF + LT + W] = below_ref[...]
        xpad_ref[:, OFF + LT + W:OFF + LT + W + 1] = zcol

        # column index of each flattened pixel; masks hoisted out of the tap loop
        col = lax.broadcasted_iota(jnp.int32, (1, LT), 1) % W
        mask_l = col >= 1          # a valid source column exists for dj == -1
        mask_r = col <= W - 2      # a valid source column exists for dj == +1

        # bias folded into accumulator init (accumulation stays in f32 throughout)
        bias = jnp.broadcast_to(b_ref[...], (C, LT)).astype(jnp.float32)
        accs = {(a, b): bias for a in (0, 1) for b in (0, 1)}

        for (di, dj, phases, row_off) in meta:
            s = di * W + dj
            xs = xpad_ref[:, OFF + s:OFF + s + LT]            # pixel q + s, halo-filled
            if dj == -1:
                xs = jnp.where(mask_l, xs, jnp.zeros_like(xs))  # kill cross-row wrap
            elif dj == 1:
                xs = jnp.where(mask_r, xs, jnp.zeros_like(xs))
            wt = w_ref[row_off:row_off + len(phases) * C, :]
            # one MXU matmul per tap; phases sharing the tap are stacked along M
            res = jnp.dot(wt, xs, preferred_element_type=jnp.float32)
            for k, ab in enumerate(phases):
                accs[ab] = accs[ab] + res[k * C:(k + 1) * C, :]

        for a in (0, 1):
            for b in (0, 1):
                o_ref[a, b, :, :] = accs[(a, b)].astype(o_ref.dtype)

    return kernel


def upsample(x, conv_w=None, conv_b=None, *, with_conv=True, compute_dtype=jnp.bfloat16):
    """Forward of the PyTorch UpSample module (NCHW) via a Pallas TPU kernel."""
    B, C, H, W = x.shape

    if not with_conv:
        # Nearest-2x upsample is a pure layout op: broadcast + reshape (no Pallas
        # launch, ~2.5x less HBM traffic than writing a phase slab and transposing).
        return jnp.broadcast_to(
            x[:, :, :, None, :, None], (B, C, H, 2, W, 2)
        ).reshape(B, C, 2 * H, 2 * W)

    assert conv_w is not None and conv_b is not None
    meta, w_all = _build_taps(conv_w.astype(jnp.float32))
    w_all = w_all.astype(compute_dtype)                  # (16*C, C) bf16 MXU operands
    bias = conv_b.reshape(C, 1).astype(jnp.float32)      # f32 accumulation

    in_bytes = np.dtype(compute_dtype).itemsize
    out_bytes = np.dtype(x.dtype).itemsize
    TH, vmem_limit = _plan_tiles(C, H, W, in_bytes, out_bytes)
    NT, LT = H // TH, TH * W

    xc = x.astype(compute_dtype)
    x3 = xc.reshape(B, C, H * W)                         # channels->sublanes, HW->lanes
    xt = xc.transpose(0, 2, 1, 3)                        # (B, H, C, W)
    zrow = jnp.zeros((B, 1, C, W), compute_dtype)
    above = jnp.concatenate([zrow, xt[:, TH - 1:H - 1:TH]], axis=1)   # (B, NT, C, W)
    below = jnp.concatenate([xt[:, TH::TH], zrow], axis=1)            # (B, NT, C, W)

    kernel = _make_conv_kernel(C, W, TH, meta, compute_dtype)

    out = pl.pallas_call(
        kernel,
        out_shape=jax.ShapeDtypeStruct((B, 2, 2, C, H * W), x.dtype),
        grid=(B, NT),
        in_specs=[
            pl.BlockSpec((None, C, LT), lambda b, rt: (b, 0, rt)),            # row tile
            pl.BlockSpec((None, None, C, W), lambda b, rt: (b, rt, 0, 0)),    # row above
            pl.BlockSpec((None, None, C, W), lambda b, rt: (b, rt, 0, 0)),    # row below
            pl.BlockSpec((16 * C, C), lambda b, rt: (0, 0)),                  # stacked taps
            pl.BlockSpec((C, 1), lambda b, rt: (0, 0)),                       # bias
        ],
        out_specs=pl.BlockSpec((None, 2, 2, C, LT), lambda b, rt: (b, 0, 0, 0, rt)),
        scratch_shapes=[pltpu.VMEM((C, LT + 2 * W + 2), compute_dtype)],
        compiler_params=pltpu.CompilerParams(
            dimension_semantics=("parallel", "parallel"),
            vmem_limit_bytes=vmem_limit,
        ),
    )(x3, above, below, w_all, bias)

    # pixel-shuffle the (a, b) phases back to NCHW: y[n,c,2i+a,2j+b] = out[n,a,b,c,i,j]
    out = out.reshape(B, 2, 2, C, H, W)
    return out.transpose(0, 3, 4, 1, 5, 2).reshape(B, C, 2 * H, 2 * W)


def reference(x, conv_w=None, conv_b=None, *, with_conv=True):
    """Pure-JAX mirror of the PyTorch forward (nearest 2x upsample + 3x3 conv)."""
    up = jnp.repeat(jnp.repeat(x, 2, axis=2), 2, axis=3)
    if not with_conv:
        return up
    y = lax.conv_general_dilated(
        up, conv_w, window_strides=(1, 1), padding=((1, 1), (1, 1)),
        dimension_numbers=("NCHW", "OIHW", "NCHW"),
        precision=lax.Precision.HIGHEST)
    return y + conv_b.reshape(1, -1, 1, 1)


if __name__ == "__main__":
    B, C, H, W = 2, 8, 16, 16
    key = jax.random.PRNGKey(0)
    kx, kw, kb = jax.random.split(key, 3)

    x = jax.random.normal(kx, (B, C, H, W), dtype=jnp.float32)
    conv_w = jax.random.normal(kw, (C, C, 3, 3), dtype=jnp.float32) / jnp.sqrt(9.0 * C)
    conv_b = 0.05 * jax.random.normal(kb, (C,), dtype=jnp.float32)

    y_ref = reference(x, conv_w, conv_b, with_conv=True)

    # f32-compute path: tight check of the phase-folded kernel math / tiling / halos.
    up_f32 = jax.jit(functools.partial(upsample, with_conv=True, compute_dtype=jnp.float32))
    y32 = jax.block_until_ready(up_f32(x, conv_w, conv_b))
    assert y32.shape == (B, C, 2 * H, 2 * W)
    err32 = float(jnp.max(jnp.abs(y32 - y_ref)))
    assert jnp.allclose(y32, y_ref, atol=1e-4, rtol=1e-4), err32

    # default bf16-operand path (MXU-friendly); f32 accumulation, looser tolerance.
    up_bf16 = jax.jit(functools.partial(upsample, with_conv=True))
    y16 = jax.block_until_ready(up_bf16(x, conv_w, conv_b))
    assert y16.shape == (B, C, 2 * H, 2 * W)
    err16 = float(jnp.max(jnp.abs(y16 - y_ref)))
    assert jnp.allclose(y16, y_ref, atol=1e-1, rtol=1e-1), err16

    # with_conv=False path: pure nearest upsample (layout-only; exact).
    y_up = jax.block_until_ready(upsample(x, with_conv=False))
    assert y_up.shape == (B, C, 2 * H, 2 * W)
    assert bool(jnp.all(y_up == reference(x, with_conv=False)))

    print("KERNEL_OK")
</pallas_src>

<mosaic_0001>
module attributes {stable_mosaic.version = 11 : i64} {
  func.func @kernel(%arg0: i32, %arg1: i32, %arg2: memref<1x8x128xf32, #tpu.memory_space<vmem>>, %arg3: memref<1x1x8x16xf32, #tpu.memory_space<vmem>>, %arg4: memref<1x1x8x16xf32, #tpu.memory_space<vmem>>, %arg5: memref<128x8xf32, #tpu.memory_space<vmem>>, %arg6: memref<8x1xf32, #tpu.memory_space<vmem>>, %arg7: memref<1x2x2x8x128xf32, #tpu.memory_space<vmem>>, %arg8: memref<8x162xf32, #tpu.memory_space<vmem>>) attributes {dimension_semantics = [#tpu.dimension_semantics<parallel>, #tpu.dimension_semantics<parallel>], iteration_bounds = array<i64: 2, 2>, scalar_prefetch = 0 : i64, scratch_operands = 1 : i64, tpu.core_type = #tpu.core_type<tc>, window_params = [{transform_indices = @transform_0, window_bounds = array<i64: 1, 8, 128>}, {transform_indices = @transform_1, window_bounds = array<i64: 1, 1, 8, 16>}, {transform_indices = @transform_2, window_bounds = array<i64: 1, 1, 8, 16>}, {pipeline_mode = #tpu.pipeline_mode<synchronous>, transform_indices = @transform_3, window_bounds = array<i64: 128, 8>}, {pipeline_mode = #tpu.pipeline_mode<synchronous>, transform_indices = @transform_4, window_bounds = array<i64: 8, 1>}, {transform_indices = @transform_5, window_bounds = array<i64: 1, 2, 2, 8, 128>}]} {
    %cst = arith.constant 0.000000e+00 : f32
    %0 = vector.broadcast %cst : f32 to vector<8x1xf32>
    %c0 = arith.constant 0 : index
    %c0_0 = arith.constant 0 : index
    %1 = vector.load %arg8[%c0, %c0_0] : memref<8x162xf32, #tpu.memory_space<vmem>>, vector<8x1xf32>
    tpu.vector_store %arg8[%c0, %c0_0], %0 {strides = array<i32>} : memref<8x162xf32, #tpu.memory_space<vmem>>, vector<8x1xf32>,
    %c0_1 = arith.constant 0 : index
    %c0_2 = arith.constant 0 : index
    %c0_3 = arith.constant 0 : index
    %c0_4 = arith.constant 0 : index
    %2 = vector.load %arg3[%c0_1, %c0_2, %c0_3, %c0_4] : memref<1x1x8x16xf32, #tpu.memory_space<vmem>>, vector<1x1x8x16xf32>
    %3 = vector.shape_cast %2 : vector<1x1x8x16xf32> to vector<8x16xf32>
    %c0_5 = arith.constant 0 : index
    %c1 = arith.constant 1 : index
    %4 = vector.load %arg8[%c0_5, %c1] : memref<8x162xf32, #tpu.memory_space<vmem>>, vector<8x16xf32>
    tpu.vector_store %arg8[%c0_5, %c1], %3 {strides = array<i32>} : memref<8x162xf32, #tpu.memory_space<vmem>>, vector<8x16xf32>,
    %c0_6 = arith.constant 0 : index
    %c0_7 = arith.constant 0 : index
    %c0_8 = arith.constant 0 : index
    %5 = vector.load %arg2[%c0_6, %c0_7, %c0_8] : memref<1x8x128xf32, #tpu.memory_space<vmem>>, vector<1x8x128xf32>
    %6 = vector.shape_cast %5 : vector<1x8x128xf32> to vector<8x128xf32>
    %c0_9 = arith.constant 0 : index
    %c17 = arith.constant 17 : index
    %7 = vector.load %arg8[%c0_9, %c17] : memref<8x162xf32, #tpu.memory_space<vmem>>, vector<8x128xf32>
    tpu.vector_store %arg8[%c0_9, %c17], %6 {strides = array<i32>} : memref<8x162xf32, #tpu.memory_space<vmem>>, vector<8x128xf32>,
    %c0_10 = arith.constant 0 : index
    %c0_11 = arith.constant 0 : index
    %c0_12 = arith.constant 0 : index
    %c0_13 = arith.constant 0 : index
    %8 = vector.load %arg4[%c0_10, %c0_11, %c0_12, %c0_13] : memref<1x1x8x16xf32, #tpu.memory_space<vmem>>, vector<1x1x8x16xf32>
    %9 = vector.shape_cast %8 : vector<1x1x8x16xf32> to vector<8x16xf32>
    %c0_14 = arith.constant 0 : index
    %c145 = arith.constant 145 : index
    %10 = vector.load %arg8[%c0_14, %c145] : memref<8x162xf32, #tpu.memory_space<vmem>>, vector<8x16xf32>
    tpu.vector_store %arg8[%c0_14, %c145], %9 {strides = array<i32>} : memref<8x162xf32, #tpu.memory_space<vmem>>, vector<8x16xf32>,
    %c0_15 = arith.constant 0 : index
    %c161 = arith.constant 161 : index
    %11 = vector.load %arg8[%c0_15, %c161] : memref<8x162xf32, #tpu.memory_space<vmem>>, vector<8x1xf32>
    tpu.vector_store %arg8[%c0_15, %c161], %0 {strides = array<i32>} : memref<8x162xf32, #tpu.memory_space<vmem>>, vector<8x1xf32>,
    %12 = tpu.iota {dimensions = array<i32: 1>} : vector<1x128xi32>
    %c16_i32 = arith.constant 16 : i32
    %c0_i32 = arith.constant 0 : i32
    %13 = arith.cmpi eq, %c16_i32, %c0_i32 : i32
    %c1_i32 = arith.constant 1 : i32
    %14 = arith.select %13, %c1_i32, %c16_i32 : i32
    %15 = vector.broadcast %14 : i32 to vector<1x128xi32>
    %16 = arith.remsi %12, %15 : vector<1x128xi32>
    %c0_i32_16 = arith.constant 0 : i32
    %17 = vector.broadcast %c0_i32_16 : i32 to vector<1x128xi32>
    %18 = arith.cmpi ne, %16, %17 : vector<1x128xi32>
    %c0_i32_17 = arith.constant 0 : i32
    %19 = vector.broadcast %c0_i32_17 : i32 to vector<1x128xi32>
    %20 = arith.cmpi slt, %16, %19 : vector<1x128xi32>
    %c0_i32_18 = arith.constant 0 : i32
    %21 = arith.cmpi slt, %14, %c0_i32_18 : i32
    %22 = vector.broadcast %21 : i1 to vector<1x128xi1>
    %23 = vector.broadcast %22 : vector<1x128xi1> to vector<1x128xi1>
    %24 = arith.xori %20, %23 : vector<1x128xi1>
    %25 = arith.andi %24, %18 : vector<1x128xi1>
    %26 = vector.broadcast %14 : i32 to vector<1x128xi32>
    %27 = arith.addi %16, %26 : vector<1x128xi32>
    %28 = arith.select %25, %27, %16 : vector<1x128xi1>, vector<1x128xi32>
    %c1_i32_19 = arith.constant 1 : i32
    %29 = vector.broadcast %c1_i32_19 : i32 to vector<1x128xi32>
    %30 = arith.cmpi sge, %28, %29 : vector<1x128xi32>
    %c14_i32 = arith.constant 14 : i32
    %31 = vector.broadcast %c14_i32 : i32 to vector<1x128xi32>
    %32 = arith.cmpi sle, %28, %31 : vector<1x128xi32>
    %c0_20 = arith.constant 0 : index
    %c0_21 = arith.constant 0 : index
    %33 = vector.load %arg6[%c0_20, %c0_21] : memref<8x1xf32, #tpu.memory_space<vmem>>, vector<8x1xf32>
    %34 = vector.shape_cast %33 : vector<8x1xf32> to vector<8x1xf32>
    %35 = vector.broadcast %34 : vector<8x1xf32> to vector<8x128xf32>
    %c0_22 = arith.constant 0 : index
    %c0_23 = arith.constant 0 : index
    %36 = vector.load %arg8[%c0_22, %c0_23] : memref<8x162xf32, #tpu.memory_space<vmem>>, vector<8x128xf32>
    %cst_24 = arith.constant 0.000000e+00 : f32
    %37 = vector.broadcast %cst_24 : f32 to vector<8x128xf32>
    %38 = vector.shape_cast %30 : vector<1x128xi1> to vector<1x128xi1>
    %39 = vector.broadcast %38 : vector<1x128xi1> to vector<8x128xi1>
    %40 = arith.select %39, %36, %37 : vector<8x128xi1>, vector<8x128xf32>
    %c0_25 = arith.constant 0 : index
    %c0_26 = arith.constant 0 : index
    %41 = vector.load %arg5[%c0_25, %c0_26] : memref<128x8xf32, #tpu.memory_space<vmem>>, vector<8x8xf32>
    %cst_27 = arith.constant dense<0.000000e+00> : vector<8x128xf32>
    %42 = tpu.matmul %41, %40, %cst_27 {dimension_numbers = #tpu.dot_dimension_numbers<[1], [0], [0], [1], [0, 0, 1, 1], [], []>} : vector<8x8xf32>, vector<8x128xf32>, vector<8x128xf32> -> vector<8x128xf32>
    %43 = arith.addf %35, %42 : vector<8x128xf32>
    %c0_28 = arith.constant 0 : index
    %c1_29 = arith.constant 1 : index
    %44 = vector.load %arg8[%c0_28, %c1_29] : memref<8x162xf32, #tpu.memory_space<vmem>>, vector<8x128xf32>
    %c8 = arith.constant 8 : index
    %c0_30 = arith.constant 0 : index
    %45 = vector.load %arg5[%c8, %c0_30] : memref<128x8xf32, #tpu.memory_space<vmem>>, vector<16x8xf32>
    %cst_31 = arith.constant dense<0.000000e+00> : vector<16x128xf32>
    %46 = tpu.matmul %45, %44, %cst_31 {dimension_numbers = #tpu.dot_dimension_numbers<[1], [0], [0], [1], [0, 0, 1, 1], [], []>} : vector<16x8xf32>, vector<8x128xf32>, vector<16x128xf32> -> vector<16x128xf32>
    %47 = vector.extract_strided_slice %46 {offsets = [0, 0], sizes = [8, 128], strides = [1, 1]} : vector<16x128xf32> to vector<8x128xf32>
    %48 = arith.addf %43, %47 : vector<8x128xf32>
    %49 = vector.extract_strided_slice %46 {offsets = [8, 0], sizes = [8, 128], strides = [1, 1]} : vector<16x128xf32> to vector<8x128xf32>
    %50 = arith.addf %35, %49 : vector<8x128xf32>
    %c0_32 = arith.constant 0 : index
    %c2 = arith.constant 2 : index
    %51 = vector.load %arg8[%c0_32, %c2] : memref<8x162xf32, #tpu.memory_space<vmem>>, vector<8x128xf32>
    %cst_33 = arith.constant 0.000000e+00 : f32
    %52 = vector.broadcast %cst_33 : f32 to vector<8x128xf32>
    %53 = vector.shape_cast %32 : vector<1x128xi1> to vector<1x128xi1>
    %54 = vector.broadcast %53 : vector<1x128xi1> to vector<8x128xi1>
    %55 = arith.select %54, %51, %52 : vector<8x128xi1>, vector<8x128xf32>
    %c24 = arith.constant 24 : index
    %c0_34 = arith.constant 0 : index
    %56 = vector.load %arg5[%c24, %c0_34] : memref<128x8xf32, #tpu.memory_space<vmem>>, vector<8x8xf32>
    %cst_35 = arith.constant dense<0.000000e+00> : vector<8x128xf32>
    %57 = tpu.matmul %56, %55, %cst_35 {dimension_numbers = #tpu.dot_dimension_numbers<[1], [0], [0], [1], [0, 0, 1, 1], [], []>} : vector<8x8xf32>, vector<8x128xf32>, vector<8x128xf32> -> vector<8x128xf32>
    %58 = arith.addf %50, %57 : vector<8x128xf32>
    %c0_36 = arith.constant 0 : index
    %c16 = arith.constant 16 : index
    %59 = vector.load %arg8[%c0_36, %c16] : memref<8x162xf32, #tpu.memory_space<vmem>>, vector<8x128xf32>
    %cst_37 = arith.constant 0.000000e+00 : f32
    %60 = vector.broadcast %cst_37 : f32 to vector<8x128xf32>
    %61 = vector.shape_cast %30 : vector<1x128xi1> to vector<1x128xi1>
    %62 = vector.broadcast %61 : vector<1x128xi1> to vector<8x128xi1>
    %63 = arith.select %62, %59, %60 : vector<8x128xi1>, vector<8x128xf32>
    %c32 = arith.constant 32 : index
    %c0_38 = arith.constant 0 : index
    %64 = vector.load %arg5[%c32, %c0_38] : memref<128x8xf32, #tpu.memory_space<vmem>>, vector<16x8xf32>
    %cst_39 = arith.constant dense<0.000000e+00> : vector<16x128xf32>
    %65 = tpu.matmul %64, %63, %cst_39 {dimension_numbers = #tpu.dot_dimension_numbers<[1], [0], [0], [1], [0, 0, 1, 1], [], []>} : vector<16x8xf32>, vector<8x128xf32>, vector<16x128xf32> -> vector<16x128xf32>
    %66 = vector.extract_strided_slice %65 {offsets = [0, 0], sizes = [8, 128], strides = [1, 1]} : vector<16x128xf32> to vector<8x128xf32>
    %67 = arith.addf %48, %66 : vector<8x128xf32>
    %68 = vector.extract_strided_slice %65 {offsets = [8, 0], sizes = [8, 128], strides = [1, 1]} : vector<16x128xf32> to vector<8x128xf32>
    %69 = arith.addf %35, %68 : vector<8x128xf32>
    %c0_40 = arith.constant 0 : index
    %c17_41 = arith.constant 17 : index
    %70 = vector.load %arg8[%c0_40, %c17_41] : memref<8x162xf32, #tpu.memory_space<vmem>>, vector<8x128xf32>
    %c48 = arith.constant 48 : index
    %c0_42 = arith.constant 0 : index
    %71 = vector.load %arg5[%c48, %c0_42] : memref<128x8xf32, #tpu.memory_space<vmem>>, vector<32x8xf32>
    %cst_43 = arith.constant dense<0.000000e+00> : vector<32x128xf32>
    %72 = tpu.matmul %71, %70, %cst_43 {dimension_numbers = #tpu.dot_dimension_numbers<[1], [0], [0], [1], [0, 0, 1, 1], [], []>} : vector<32x8xf32>, vector<8x128xf32>, vector<32x128xf32> -> vector<32x128xf32>
    %73 = vector.extract_strided_slice %72 {offsets = [0, 0], sizes = [8, 128], strides = [1, 1]} : vector<32x128xf32> to vector<8x128xf32>
    %74 = arith.addf %67, %73 : vector<8x128xf32>
    %75 = vector.extract_strided_slice %72 {offsets = [8, 0], sizes = [8, 128], strides = [1, 1]} : vector<32x128xf32> to vector<8x128xf32>
    %76 = arith.addf %58, %75 : vector<8x128xf32>
    %77 = vector.extract_strided_slice %72 {offsets = [16, 0], sizes = [8, 128], strides = [1, 1]} : vector<32x128xf32> to vector<8x128xf32>
    %78 = arith.addf %69, %77 : vector<8x128xf32>
    %79 = vector.extract_strided_slice %72 {offsets = [24, 0], sizes = [8, 128], strides = [1, 1]} : vector<32x128xf32> to vector<8x128xf32>
    %80 = arith.addf %35, %79 : vector<8x128xf32>
    %c0_44 = arith.constant 0 : index
    %c18 = arith.constant 18 : index
    %81 = vector.load %arg8[%c0_44, %c18] : memref<8x162xf32, #tpu.memory_space<vmem>>, vector<8x128xf32>
    %cst_45 = arith.constant 0.000000e+00 : f32
    %82 = vector.broadcast %cst_45 : f32 to vector<8x128xf32>
    %83 = vector.shape_cast %32 : vector<1x128xi1> to vector<1x128xi1>
    %84 = vector.broadcast %83 : vector<1x128xi1> to vector<8x128xi1>
    %85 = arith.select %84, %81, %82 : vector<8x128xi1>, vector<8x128xf32>
    %c80 = arith.constant 80 : index
    %c0_46 = arith.constant 0 : index
    %86 = vector.load %arg5[%c80, %c0_46] : memref<128x8xf32, #tpu.memory_space<vmem>>, vector<16x8xf32>
    %cst_47 = arith.constant dense<0.000000e+00> : vector<16x128xf32>
    %87 = tpu.matmul %86, %85, %cst_47 {dimension_numbers = #tpu.dot_dimension_numbers<[1], [0], [0], [1], [0, 0, 1, 1], [], []>} : vector<16x8xf32>, vector<8x128xf32>, vector<16x128xf32> -> vector<16x128xf32>
    %88 = vector.extract_strided_slice %87 {offsets = [0, 0], sizes = [8, 128], strides = [1, 1]} : vector<16x128xf32> to vector<8x128xf32>
    %89 = arith.addf %76, %88 : vector<8x128xf32>
    %90 = vector.extract_strided_slice %87 {offsets = [8, 0], sizes = [8, 128], strides = [1, 1]} : vector<16x128xf32> to vector<8x128xf32>
    %91 = arith.addf %80, %90 : vector<8x128xf32>
    %c0_48 = arith.constant 0 : index
    %c32_49 = arith.constant 32 : index
    %92 = vector.load %arg8[%c0_48, %c32_49] : memref<8x162xf32, #tpu.memory_space<vmem>>, vector<8x128xf32>
    %cst_50 = arith.constant 0.000000e+00 : f32
    %93 = vector.broadcast %cst_50 : f32 to vector<8x128xf32>
    %94 = vector.shape_cast %30 : vector<1x128xi1> to vector<1x128xi1>
    %95 = vector.broadcast %94 : vector<1x128xi1> to vector<8x128xi1>
    %96 = arith.select %95, %92, %93 : vector<8x128xi1>, vector<8x128xf32>
    %c96 = arith.constant 96 : index
    %c0_51 = arith.constant 0 : index
    %97 = vector.load %arg5[%c96, %c0_51] : memref<128x8xf32, #tpu.memory_space<vmem>>, vector<8x8xf32>
    %cst_52 = arith.constant dense<0.000000e+00> : vector<8x128xf32>
    %98 = tpu.matmul %97, %96, %cst_52 {dimension_numbers = #tpu.dot_dimension_numbers<[1], [0], [0], [1], [0, 0, 1, 1], [], []>} : vector<8x8xf32>, vector<8x128xf32>, vector<8x128xf32> -> vector<8x128xf32>
    %99 = arith.addf %78, %98 : vector<8x128xf32>
    %c0_53 = arith.constant 0 : index
    %c33 = arith.constant 33 : index
    %100 = vector.load %arg8[%c0_53, %c33] : memref<8x162xf32, #tpu.memory_space<vmem>>, vector<8x128xf32>
    %c104 = arith.constant 104 : index
    %c0_54 = arith.constant 0 : index
    %101 = vector.load %arg5[%c104, %c0_54] : memref<128x8xf32, #tpu.memory_space<vmem>>, vector<16x8xf32>
    %cst_55 = arith.constant dense<0.000000e+00> : vector<16x128xf32>
    %102 = tpu.matmul %101, %100, %cst_55 {dimension_numbers = #tpu.dot_dimension_numbers<[1], [0], [0], [1], [0, 0, 1, 1], [], []>} : vector<16x8xf32>, vector<8x128xf32>, vector<16x128xf32> -> vector<16x128xf32>
    %103 = vector.extract_strided_slice %102 {offsets = [0, 0], sizes = [8, 128], strides = [1, 1]} : vector<16x128xf32> to vector<8x128xf32>
    %104 = arith.addf %99, %103 : vector<8x128xf32>
    %105 = vector.extract_strided_slice %102 {offsets = [8, 0], sizes = [8, 128], strides = [1, 1]} : vector<16x128xf32> to vector<8x128xf32>
    %106 = arith.addf %91, %105 : vector<8x128xf32>
    %c0_56 = arith.constant 0 : index
    %c34 = arith.constant 34 : index
    %107 = vector.load %arg8[%c0_56, %c34] : memref<8x162xf32, #tpu.memory_space<vmem>>, vector<8x128xf32>
    %cst_57 = arith.constant 0.000000e+00 : f32
    %108 = vector.broadcast %cst_57 : f32 to vector<8x128xf32>
    %109 = vector.shape_cast %32 : vector<1x128xi1> to vector<1x128xi1>
    %110 = vector.broadcast %109 : vector<1x128xi1> to vector<8x128xi1>
    %111 = arith.select %110, %107, %108 : vector<8x128xi1>, vector<8x128xf32>
    %c120 = arith.constant 120 : index
    %c0_58 = arith.constant 0 : index
    %112 = vector.load %arg5[%c120, %c0_58] : memref<128x8xf32, #tpu.memory_space<vmem>>, vector<8x8xf32>
    %cst_59 = arith.constant dense<0.000000e+00> : vector<8x128xf32>
    %113 = tpu.matmul %112, %111, %cst_59 {dimension_numbers = #tpu.dot_dimension_numbers<[1], [0], [0], [1], [0, 0, 1, 1], [], []>} : vector<8x8xf32>, vector<8x128xf32>, vector<8x128xf32> -> vector<8x128xf32>
    %114 = arith.addf %106, %113 : vector<8x128xf32>
    %c0_60 = arith.constant 0 : index
    %c0_61 = arith.constant 0 : index
    %c0_62 = arith.constant 0 : index
    %c0_63 = arith.constant 0 : index
    %c0_64 = arith.constant 0 : index
    %115 = vector.load %arg7[%c0_60, %c0_61, %c0_62, %c0_63, %c0_64] : memref<1x2x2x8x128xf32, #tpu.memory_space<vmem>>, vector<1x1x1x8x128xf32>
    %116 = vector.shape_cast %115 : vector<1x1x1x8x128xf32> to vector<8x128xf32>
    %117 = vector.shape_cast %74 : vector<8x128xf32> to vector<1x1x1x8x128xf32>
    tpu.vector_store %arg7[%c0_60, %c0_61, %c0_62, %c0_63, %c0_64], %117 {strides = array<i32>} : memref<1x2x2x8x128xf32, #tpu.memory_space<vmem>>, vector<1x1x1x8x128xf32>,
    %c0_65 = arith.constant 0 : index
    %c0_66 = arith.constant 0 : index
    %c1_67 = arith.constant 1 : index
    %c0_68 = arith.constant 0 : index
    %c0_69 = arith.constant 0 : index
    %118 = vector.load %arg7[%c0_65, %c0_66, %c1_67, %c0_68, %c0_69] : memref<1x2x2x8x128xf32, #tpu.memory_space<vmem>>, vector<1x1x1x8x128xf32>
    %119 = vector.shape_cast %118 : vector<1x1x1x8x128xf32> to vector<8x128xf32>
    %120 = vector.shape_cast %89 : vector<8x128xf32> to vector<1x1x1x8x128xf32>
    tpu.vector_store %arg7[%c0_65, %c0_66, %c1_67, %c0_68, %c0_69], %120 {strides = array<i32>} : memref<1x2x2x8x128xf32, #tpu.memory_space<vmem>>, vector<1x1x1x8x128xf32>,
    %c0_70 = arith.constant 0 : index
    %c1_71 = arith.constant 1 : index
    %c0_72 = arith.constant 0 : index
    %c0_73 = arith.constant 0 : index
    %c0_74 = arith.constant 0 : index
    %121 = vector.load %arg7[%c0_70, %c1_71, %c0_72, %c0_73, %c0_74] : memref<1x2x2x8x128xf32, #tpu.memory_space<vmem>>, vector<1x1x1x8x128xf32>
    %122 = vector.shape_cast %121 : vector<1x1x1x8x128xf32> to vector<8x128xf32>
    %123 = vector.shape_cast %104 : vector<8x128xf32> to vector<1x1x1x8x128xf32>
    tpu.vector_store %arg7[%c0_70, %c1_71, %c0_72, %c0_73, %c0_74], %123 {strides = array<i32>} : memref<1x2x2x8x128xf32, #tpu.memory_space<vmem>>, vector<1x1x1x8x128xf32>,
    %c0_75 = arith.constant 0 : index
    %c1_76 = arith.constant 1 : index
    %c1_77 = arith.constant 1 : index
    %c0_78 = arith.constant 0 : index
    %c0_79 = arith.constant 0 : index
    %124 = vector.load %arg7[%c0_75, %c1_76, %c1_77, %c0_78, %c0_79] : memref<1x2x2x8x128xf32, #tpu.memory_space<vmem>>, vector<1x1x1x8x128xf32>
    %125 = vector.shape_cast %124 : vector<1x1x1x8x128xf32> to vector<8x128xf32>
    %126 = vector.shape_cast %114 : vector<8x128xf32> to vector<1x1x1x8x128xf32>
    tpu.vector_store %arg7[%c0_75, %c1_76, %c1_77, %c0_78, %c0_79], %126 {strides = array<i32>} : memref<1x2x2x8x128xf32, #tpu.memory_space<vmem>>, vector<1x1x1x8x128xf32>,
    return
  }
  func.func @transform_0(%arg0: i32, %arg1: i32) -> (i32, i32, i32) {
    %c0_i32 = arith.constant 0 : i32
    %c0_i32_0 = arith.constant 0 : i32
    return %arg0, %c0_i32, %arg1 : i32, i32, i32
  }
  func.func @transform_1(%arg0: i32, %arg1: i32) -> (i32, i32, i32, i32) {
    %c0_i32 = arith.constant 0 : i32
    %c0_i32_0 = arith.constant 0 : i32
    %c0_i32_1 = arith.constant 0 : i32
    return %arg0, %arg1, %c0_i32, %c0_i32_0 : i32, i32, i32, i32
  }
  func.func @transform_2(%arg0: i32, %arg1: i32) -> (i32, i32, i32, i32) {
    %c0_i32 = arith.constant 0 : i32
    %c0_i32_0 = arith.constant 0 : i32
    %c0_i32_1 = arith.constant 0 : i32
    return %arg0, %arg1, %c0_i32, %c0_i32_0 : i32, i32, i32, i32
  }
  func.func @transform_3(%arg0: i32, %arg1: i32) -> (i32, i32) {
    %c0_i32 = arith.constant 0 : i32
    %c0_i32_0 = arith.constant 0 : i32
    %c0_i32_1 = arith.constant 0 : i32
    return %c0_i32, %c0_i32_0 : i32, i32
  }
  func.func @transform_4(%arg0: i32, %arg1: i32) -> (i32, i32) {
    %c0_i32 = arith.constant 0 : i32
    %c0_i32_0 = arith.constant 0 : i32
    %c0_i32_1 = arith.constant 0 : i32
    return %c0_i32, %c0_i32_0 : i32, i32
  }
  func.func @transform_5(%arg0: i32, %arg1: i32) -> (i32, i32, i32, i32, i32) {
    %c0_i32 = arith.constant 0 : i32
    %c0_i32_0 = arith.constant 0 : i32
    %c0_i32_1 = arith.constant 0 : i32
    %c0_i32_2 = arith.constant 0 : i32
    return %arg0, %c0_i32, %c0_i32_0, %c0_i32_1, %arg1 : i32, i32, i32, i32, i32
  }
}

</mosaic_0001>

<bundles_post_ra>
// kernel: upsample.1
= control target key start
LH: loop header
LB: loop body
LE: loop exit
PB: predicated region body
PF: predicated region fallthrough
CT: control target
= control target key end

     0   :  { %s1625_s18 = smov 0   ;;  %s1627_s19 = smov 0   ;;  %s1831_s0 = inlined_call_operand.vmem [shape: f32[2,8,256], index: 0, kind: input, shape index: {}]   ;;  %s1832_s1 = inlined_call_operand.vmem [shape: f32[2,2,8,16], index: 1, kind: input, shape index: {}]   ;;  %s1833_s2 = inlined_call_operand.vmem [shape: f32[2,2,8,16], index: 2, kind: input, shape index: {}]   ;;  %s1834_s3 = inlined_call_operand.vmem [shape: f32[128,8], index: 3, kind: input, shape index: {}]   ;;  %s1835_s4 = inlined_call_operand.vmem [shape: f32[8,1], index: 4, kind: input, shape index: {}]   ;;  %s1836_s5 = inlined_call_operand.vmem [shape: f32[2,2,2,8,256], index: 5, kind: output, shape index: {}]  }
   0x1   :  { %s1629_s20 = smov 0   ;;  %s1631_s21 = smov 0  }
   0x2   :  { %s1633_s22 = smov 0   ;;  %s1635_s23 = smov 0  }
   0x3   :  { %s1637_s24 = smov 0  }
   0x4 LB: > { %s24_s25 = sadd.s32 1, %s1572_s22  ;;  %s27_s26 = sadd.s32 1, %s1576_s23  ;;  %s1580_s24 = sphi %s1637_s24, %s15_s24   ;;  %s1576_s23 = sphi %s1635_s23, %s1850_s23   ;;  %s1572_s22 = sphi %s1633_s22, %s1849_s22   ;;  %s1568_s21 = sphi %s1631_s21, %s1848_s21   ;;  %s1564_s20 = sphi %s1629_s20, %s1847_s20   ;;  %s1560_s19 = sphi %s1627_s19, %s1846_s19   ;;  %s1556_s18 = sphi %s1625_s18, %s1845_s18  }
   0x5   : > { %p25_p0 = scmp.ge.s32.totalorder %s24_s25, 2  ;;  %s1340_s27 = sadd.s32 4294967295, %s1580_s24  }
   0x6   : > { %p172_p1 = scmp.ne.s32.totalorder %s1560_s19, %s1556_s18  ;;  %p173_p2 = scmp.eq.s32.totalorder %s1340_s27, 3 }
   0x7   : > { %s1852_s25 = smov (%p25_p0, %s24_s25), 0  ;;  %s1854_s26 = smov (!%p25_p0, %s27_s26), %s1576_s23 }
   0x8   : > { %s158_s28 = ssub.s32 %s1572_s22, %s1852_s25  ;;  %p29_p3 = scmp.ge.s32.totalorder %s1854_s26, 2 }
   0x9   : > { %p1344_p4 = scmp.ge.s32.totalorder %s1580_s24, 1  ;;  %p1671_p5 = por %p173_p2, %p172_p1 }
   0xa   : > { %p236_p6 = scmp.lt.s32.totalorder %s1580_s24, 5  ;;  %s1856_s26 = smov (%p29_p3, %s1854_s26), 0 }
   0xb   : > { %1839 = sst [smem:[#allocation4_spill]] %s1856_s26  ;;  %s157_s30 = ssub.s32 %s1576_s23, %s1856_s26 }
   0xc   : > { %p237_p7 = pnand %p1344_p4, %p236_p6  ;;  %s159_s6 = sor.u32 %s158_s28, %s157_s30 }
   0xd   : > { %s162_s7 = sadd.s32 1, %s1560_s19  ;;  %p160_p8 = scmp.eq.s32.totalorder %s159_s6, 0  ;;  %vm306_vm0 = vcmask (!%p237_p7), 7168   ;;  %v1582_v0 = vmov (!%p237_p7), 0.0   ;;  %vm322_vm1 = vcmask (!%p237_p7), 138240   ;;  %vm329_vm2 = vcmask (!%p237_p7), 269448  }
   0xe   : > { %240 = sbr.rel (%p237_p7) target bundleno = 524 (0x20c), region = 40  ;;  %p282_p9 = scmp.lt.s32.totalorder (!%p237_p7), %s1568_s21, 1  ;;  %1407 = vmatprep.subr.mxu0 (!%p237_p7), %v1582_v0  ;;  %307 = vst.msk [vmem:[#allocation2] sm:$0xff] (!%p237_p7), %vm306_vm0, %v1582_v0  ;;  %v333_v4 = vlaneseq (!%p237_p7)  ;;  %vm331_vm3 = vcmask (!%p237_p7), 277768   ;;  %vm313_vm4 = vcmask (!%p237_p7), 138248   ;;  %vm320_vm5 = vcmask (!%p237_p7), 1047688  }
   0xf   : > { %s1682_s8 = scalar_select %p160_p8, %s1560_s19, %s162_s7  }
  0x10   : > { %p284_p10 = scmp.lt.s32.totalorder (!%p237_p7), %s1564_s20, 1  ;;  %s1583_s26 = smov (!%p237_p7), 17   ;;  %v334_v7 = vand.u32 (!%p237_p7), 127, %v333_v4  ;;  %vm1585_vm6 = vmmov (!%p237_p7), 0   ;;  %vm360_vm7 = vcmask (!%p237_p7), 64512   ;;  %v437_v10 = vld [vmem:[%s1834_s3 + $0x8] sm:$0xff] (!%p237_p7) }
  0x11   : > { %1409 = vmatprep.mubr.msk.f32.mxu0 (!%p237_p7), %vm1585_vm6, %v1582_v0  ;;  %1414 = vmatprep.mubr.msk.f32.mxu1 (!%p237_p7), %vm360_vm7, %v437_v10  ;;  %v359_v14 = vld [vmem:[%s1834_s3] sm:$0xff] (!%p237_p7)  ;;  %s1587_s14 = smov (!%p237_p7), 126   ;;  %s1588_s15 = smov (!%p237_p7), 112   ;;  %v1592_v15 = vmov (!%p237_p7), 0   ;;  %vm445_vm9 = vcmask (!%p237_p7), 1039360   ;;  %v438_v21 = vld [vmem:[%s1834_s3 + $0x10] sm:$0xff] (!%p237_p7) }
  0x12   : > { %v339_v9 = vand.u32 (!%p237_p7), 15, %v334_v7  ;;  %s1590_s17 = smov (!%p237_p7), 110   ;;  %s1591_s27 = smov (!%p237_p7), 96   ;;  %1524 = vset.pattern.permute.xlu1 (!%p237_p7), %v1592_v15  ;;  %1525 = vset.pattern.permute.xlu0 (!%p237_p7), %v1592_v15  ;;  %v349_v16 = vld [vmem:[%s1835_s4] sm:$0xff] (!%p237_p7)  ;;  %vm537_vm10 = vcmask (!%p237_p7), 1031168   ;;  %v541_v25 = vld [vmem:[%s1834_s3 + $0x18] sm:$0xff] (!%p237_p7) }
  0x13   : > { %s1594_s30 = smov (!%p237_p7), 94   ;;  %v624_v22 = vld [vmem:[%s1834_s3 + $0x20] sm:$0xff] (!%p237_p7)  ;;  %v709_v28 = vld [vmem:[%s1834_s3 + $0x30] sm:$0xff] (!%p237_p7)  ;;  %vm620_vm12 = vcmask (!%p237_p7), 916480   ;;  %v625_v32 = vld [vmem:[%s1834_s3 + $0x28] sm:$0xff] (!%p237_p7)  ;;  %vm717_vm13 = vcmask (!%p237_p7), 908288  }
  0x14   : > { %vm1706_vm8 = vcmp.ge.s32.totalorder (!%p237_p7), %v339_v9, 1  ;;  %vm1728_vm11 = vcmp.le.s32.totalorder (!%p237_p7), %v339_v9, 14  ;;  %v829_v33 = vld [vmem:[%s1834_s3 + $0x50] sm:$0xff] (!%p237_p7)  ;;  %v710_v37 = vld [vmem:[%s1834_s3 + $0x38] sm:$0xff] (!%p237_p7)  ;;  %vm825_vm14 = vcmask (!%p237_p7), 900096   ;;  %v711_v38 = vld [vmem:[%s1834_s3 + $0x40] sm:$0xff] (!%p237_p7) }
  0x15   : > { %s283_s9 = scalar_select %p282_p9, %s1568_s21, 1  ;;  %v830_v42 = vld [vmem:[%s1834_s3 + $0x58] sm:$0xff]  ;;  %vm918_vm15 = vcmask 785408   ;;  %v712_v43 = vld [vmem:[%s1834_s3 + $0x48] sm:$0xff]  ;;  %v922_v48 = vld [vmem:[%s1834_s3 + $0x60] sm:$0xff]  ;;  %vm1003_vm0 = vcmask 777216  }
  0x16   : > { %s285_s10 = scalar_select %p284_p10, %s1564_s20, 1  ;;  %v997_v44 = vld [vmem:[%s1834_s3 + $0x68] sm:$0xff]  ;;  %v998_v51 = vld [vmem:[%s1834_s3 + $0x70] sm:$0xff]  ;;  %v1097_v54 = vld [vmem:[%s1834_s3 + $0x78] sm:$0xff] }
  0x17   : > { %s1346_s11 = sshll.u32 %s283_s9, 1  ;;  %s1584_s9 = smov 1  }
  0x18   : > { %s287_s12 = sadd.s32 %s1346_s11, %s285_s10  ;;  %s1586_s11 = smov 127  }
  0x19   : > { %s1347_s13 = sshll.u32 %s287_s12, 3  ;;  %s279_s6 = sand.u32 1, %s1556_s18  }
  0x1a   : > { %s289_s16 = scalar_lea.vmem %s1831_s0, %s1347_s13  ;;  %s305_s28 = scalar_lea.vmem %s1833_s2, %s1347_s13 }
  0x1b   : > { %v315_v1 = vld [vmem:[%s289_s16] sm:$0xff]  ;;  %s297_s7 = scalar_lea.vmem %s1832_s1, %s1347_s13  ;;  %s1589_s16 = smov 111  }
  0x1c   : > { %v324_v2 = vld [vmem:[%s305_s28] sm:$0xff]  ;;  %317 = vrot.lane.b32.xlu0 %v315_v1, %s1583_s26  ;;  %s1593_s28 = smov 95   ;;  %s1378_s18 = sshll.u32 (%p1671_p5), %s1568_s21, 3 }
  0x1d   : > { %326 = vrot.lane.b32.xlu1 %v324_v2, %s1583_s26  ;;  %v308_v3 = vld [vmem:[%s297_s7] sm:$0xff]  ;;  %s1345_s7 = sshll.u32 %s279_s6, 5  ;;  %s1187_s26 = sadd.s32 (%p1671_p5), %s1564_s20, %s1378_s18 }
  0x1e   : > { %s1379_s10 = sshll.u32 (%p1671_p5), %s1187_s26, 3 }
  0x1f   : > { %s1189_s13 = scalar_lea.vmem (%p1671_p5), %s1836_s5, %s1379_s10 }
  0x20   : > { %310 = vrot.lane.b32.xlu0 %v308_v3, %s1584_s9  ;;  %s281_s9 = scalar_lea.vmem [#allocation3], %s1345_s7 }
  0x8e   : > { %v318_v5 = vpop.permute.xlu0 %317 }
  0x8f   : > { %v327_v6 = vpop.permute.xlu1 %326  ;;  %323 = vst.msk [vmem:[#allocation2 + $0x8] sm:$0xff] %vm322_vm1, %v318_v5  ;;  %vm1093_vm1 = vcmask 769024  }
  0x90   : > { %330 = vst.msk [vmem:[#allocation2 + $0x8] sm:$0xff] %vm329_vm2, %v327_v6 }
  0x91   : > { %332 = vst.msk [vmem:[#allocation2 + $0x8] sm:$0xff] %vm331_vm3, %v1582_v0 }
  0x92   : > { %v311_v8 = vpop.permute.xlu0 %310 }
  0x93   : > { %314 = vst.msk [vmem:[#allocation2] sm:$0xff] %vm313_vm4, %v311_v8 }
  0x94   : > { %321 = vst.msk [vmem:[#allocation2] sm:$0xff] %vm320_vm5, %v318_v5 }
  0x98   : > { %v436_v11 = vld [vmem:[#allocation2 + $0x8] sm:$0xff] }
  0x99   : > { %443 = vrot.lane.b32.xlu0 %v436_v11, %s1586_s11 }
  0x9b   : > { %v435_v13 = vld [vmem:[#allocation2] sm:$0xff] }
  0x9c   : > { %441 = vrot.lane.b32.xlu1 %v435_v13, %s1586_s11  ;;  %1408 = vmatpush3.msk.msra.mxu0 %vm1706_vm8, %v435_v13 }
  0x9d   : > { %535 = vrot.lane.b32.xlu0 %v436_v11, %s1587_s14  ;;  %1417 = vmatprep.subr.mxu0 %v1582_v0 }
  0x9e   : > { %1410 = vmatmul.mubr.msk.f32.vlgmr.msra.gmra.mrb[0].mxu0 %vm360_vm7, %v359_v14 }
  0x9f   : > { %1419 = vmatprep.mubr.msk.f32.mxu0 %vm1585_vm6, %v1582_v0 }
  0xa0   : > { %533 = vrot.lane.b32.xlu1 %v435_v13, %s1587_s14 }
  0xa1   : > { %618 = vrot.lane.b32.xlu0 %v436_v11, %s1588_s15 }
  0xa4   : > { %616 = vrot.lane.b32.xlu1 %v435_v13, %s1588_s15 }
  0xa5   : > { %715 = vrot.lane.b32.xlu0 %v436_v11, %s1589_s16 }
  0xa8   : > { %713 = vrot.lane.b32.xlu1 %v435_v13, %s1589_s16 }
  0xa9   : > { %823 = vrot.lane.b32.xlu0 %v436_v11, %s1590_s17 }
  0xac   : > { %821 = vrot.lane.b32.xlu1 %v435_v13, %s1590_s17 }
  0xad   : > { %916 = vrot.lane.b32.xlu0 %v436_v11, %s1591_s27 }
  0xb0   : > { %914 = vrot.lane.b32.xlu1 %v435_v13, %s1591_s27 }
  0xb1   : > { %1001 = vrot.lane.b32.xlu0 %v436_v11, %s1593_s28 }
  0xb4   : > { %999 = vrot.lane.b32.xlu1 %v435_v13, %s1593_s28 }
  0xb5   : > { %1091 = vrot.lane.b32.xlu0 %v436_v11, %s1594_s30 }
  0xb8   : > { %1089 = vrot.lane.b32.xlu1 %v435_v13, %s1594_s30 }
  0xbc   : > { %352 = vperm.xlu1 %1524, %v349_v16  }
 0x10b   : > { %v444_v17 = vpop.permute.xlu0 %443 }
 0x10e   : > { %v442_v18 = vpop.permute.xlu1 %441 }
 0x10f   : > { %v446_v19 = vsel %vm445_vm9, %v442_v18, %v444_v17  ;;  %v536_v20 = vpop.permute.xlu0 %535 }
 0x110   : > { %1412 = vmatprep.subr.mxu1 %v446_v19 }
 0x111   : > { %1413 = vmatpush3.msra.mxu1 %v446_v19 }
 0x112   : > { %v534_v24 = vpop.permute.xlu1 %533  ;;  %1415 = vmatmul.mubr.msk.f32.vlgmr.msra.gmra.mrb[0].mxu1 %vm360_vm7, %v438_v21 }
 0x113   : > { %v538_v26 = vsel %vm537_vm10, %v534_v24, %v536_v20  ;;  %v619_v27 = vpop.permute.xlu0 %618  ;;  %1424 = vmatprep.mubr.msk.f32.mxu1 %vm360_vm7, %v624_v22 }
 0x114   : > { %1418 = vmatpush3.msk.msra.mxu0 %vm1728_vm11, %v538_v26 }
 0x115   : > { %1420 = vmatmul.mubr.msk.f32.vlgmr.msra.gmra.mrb[2].mxu0 %vm360_vm7, %v541_v25 }
 0x116   : > { %v617_v29 = vpop.permute.xlu1 %616  ;;  %1429 = vmatprep.mubr.msk.f32.mxu0 %vm360_vm7, %v709_v28 }
 0x117   : > { %v621_v30 = vsel %vm620_vm12, %v617_v29, %v619_v27  ;;  %v716_v31 = vpop.permute.xlu0 %715 }
 0x118   : > { %1422 = vmatprep.subr.msk.mxu1 %vm1706_vm8, %v621_v30 }
 0x119   : > { %1423 = vmatpush3.msk.msra.mxu1 %vm1706_vm8, %v621_v30 }
 0x11a   : > { %v714_v34 = vpop.permute.xlu1 %713  ;;  %1425 = vmatmul.mubr.msk.f32.vlgmr.msra.gmra.mrb[2].mxu1 %vm360_vm7, %v625_v32 }
 0x11b   : > { %v718_v35 = vsel %vm717_vm13, %v714_v34, %v716_v31  ;;  %v824_v36 = vpop.permute.xlu0 %823  ;;  %1437 = vmatprep.mubr.msk.f32.mxu1 %vm360_vm7, %v829_v33 }
 0x11c   : > { %1427 = vmatprep.subr.mxu0 %v718_v35 }
 0x11d   : > { %1428 = vmatpush3.msra.mxu0 %v718_v35 }
 0x11e   : > { %v822_v39 = vpop.permute.xlu1 %821  ;;  %1430 = vmatmul.mubr.msk.f32.vlgmr.msra.gmra.mrb[4].mxu0 %vm360_vm7, %v710_v37 }
 0x11f   : > { %v826_v40 = vsel %vm825_vm14, %v822_v39, %v824_v36  ;;  %v917_v41 = vpop.permute.xlu0 %916  ;;  %1432 = vmatprep.mubr.msk.f32.mxu0 %vm360_vm7, %v711_v38 }
 0x120   : > { %1435 = vmatprep.subr.msk.mxu1 %vm1728_vm11, %v826_v40 }
 0x121   : > { %1436 = vmatpush3.msk.msra.mxu1 %vm1728_vm11, %v826_v40 }
 0x122   : > { %v915_v45 = vpop.permute.xlu1 %914  ;;  %1440 = vmatprep.subr.mxu1 %v1582_v0  ;;  %1438 = vmatmul.mubr.msk.f32.vlgmr.msra.gmra.mrb[4].mxu1 %vm360_vm7, %v830_v42 }
 0x123   : > { %v919_v46 = vsel %vm918_vm15, %v915_v45, %v917_v41  ;;  %v1002_v47 = vpop.permute.xlu0 %1001  ;;  %1433 = vmatmul.mubr.msk.f32.gmra.mrb[6].mxu0 %vm360_vm7, %v712_v43  ;;  %1442 = vmatprep.mubr.msk.f32.mxu1 %vm1585_vm6, %v1582_v0 }
 0x124   : > { %1441 = vmatpush3.msk.msra.mxu1 %vm1706_vm8, %v919_v46  ;;  %1447 = vmatprep.mubr.msk.f32.mxu0 %vm360_vm7, %v997_v44 }
 0x125   : > { %1450 = vmatprep.subr.mxu1 %v1582_v0 }
 0x126   : > { %v1000_v49 = vpop.permute.xlu1 %999  ;;  %1443 = vmatmul.mubr.msk.f32.vlgmr.msra.gmra.mrb[6].mxu1 %vm360_vm7, %v922_v48 }
 0x127   : > { %v1004_v50 = vsel %vm1003_vm0, %v1000_v49, %v1002_v47  ;;  %1452 = vmatprep.mubr.msk.f32.mxu1 %vm1585_vm6, %v1582_v0  ;;  %v1092_v52 = vpop.permute.xlu0 %1091 }
 0x128   : > { %1445 = vmatprep.subr.mxu0 %v1004_v50 }
 0x129   : > { %1446 = vmatpush3.msra.mxu0 %v1004_v50 }
 0x12a   : > { %v1090_v53 = vpop.permute.xlu1 %1089  ;;  %1448 = vmatmul.mubr.msk.f32.vlgmr.msra.gmra.mrb[8].mxu0 %vm360_vm7, %v998_v51 }
 0x12b   : > { %v1094_v55 = vsel %vm1093_vm1, %v1090_v53, %v1092_v52 }
 0x12c   : > { %1451 = vmatpush3.msk.msra.mxu1 %vm1728_vm11, %v1094_v55 }
 0x12d   : > { %1453 = vmatmul.mubr.msk.f32.vlgmr.msra.gmra.mrb[8].mxu1 %vm360_vm7, %v1097_v54 }
 0x13b   : > { %v353_v58 = vpop.permute.xlu1 %352 }
 0x171   : > { %v430_v56 = vpop.f32.mrb[0].mxu0 }
 0x172   : > { %v1411_v57 = vpop.f32.mrb[1].mxu0  ;;  %v434_v59 = vadd.f32 %v430_v56, %v353_v58 }
 0x1e5   : > { %v1416_v60 = vpop.f32.mrb[0].mxu1 }
 0x1e6   : > { %v530_v61 = vadd.f32 %v1416_v60, %v353_v58  ;;  %v520_v62 = vpop.f32.mrb[1].mxu1 }
 0x1e7   : > { %v529_v63 = vadd.f32 %v520_v62, %v434_v59 }
 0x1e8   : > { %v611_v0 = vpop.f32.mrb[2].mxu0 }
 0x1e9   : > { %v615_v1 = vadd.f32 %v611_v0, %v530_v61  ;;  %v1421_v2 = vpop.f32.mrb[3].mxu0 }
 0x1ed   : > { %v1426_v3 = vpop.f32.mrb[2].mxu1 }
 0x1ee   : > { %v698_v4 = vpop.f32.mrb[3].mxu1  ;;  %v708_v10 = vadd.f32 %v1426_v3, %v353_v58 }
 0x1ef   : > { %v707_v5 = vadd.f32 %v698_v4, %v529_v63 }
 0x1f1   : > { %v1431_v6 = vpop.f32.mrb[4].mxu0 }
 0x1f2   : > { %v818_v7 = vadd.f32 %v1431_v6, %v615_v1  ;;  %v798_v8 = vpop.f32.mrb[5].mxu0 }
 0x1f3   : > { %v817_v9 = vadd.f32 %v798_v8, %v707_v5 }
 0x1f5   : > { %1172 = vst [vmem:[%s281_s9] sm:$0xff] %v817_v9  ;;  %v1439_v11 = vpop.f32.mrb[4].mxu1 }
 0x1f6   : > { %v1434_v12 = vpop.f32.mrb[6].mxu0  ;;  %v903_v13 = vpop.f32.mrb[5].mxu1 }
 0x1f7   : > { %v820_v14 = vadd.f32 %v1434_v12, %v353_v58  ;;  %v808_v15 = vpop.f32.mrb[7].mxu0  ;;  %v912_v16 = vadd.f32 %v903_v13, %v818_v7 }
 0x1f8   : > { %v819_v17 = vadd.f32 %v808_v15, %v708_v10 }
 0x1f9   : > { %v913_v18 = vadd.f32 %v1439_v11, %v820_v14  ;;  %1374 = vst [vmem:[%s281_s9 + $0x8] sm:$0xff] %v912_v16  ;;  %v992_v19 = vpop.f32.mrb[6].mxu1 }
 0x1fa   : > { %v996_v20 = vadd.f32 %v992_v19, %v819_v17  ;;  %v1444_v21 = vpop.f32.mrb[7].mxu1 }
 0x1fc   : > { %v1223_v29 = vld [vmem:[%s281_s9] sm:$0xff] (%p1671_p5) }
 0x1fd   : > { %v1449_v22 = vpop.f32.mrb[8].mxu0  ;;  %1185 = sbr.rel (!%p1671_p5) target bundleno = 524 (0x20c), region = 44  ;;  %1224 = vst [vmem:[%s1189_s13] sm:$0xff] (%p1671_p5), %v1223_v29 }
 0x1fe   : > { %v1088_v23 = vadd.f32 %v1449_v22, %v913_v18  ;;  %v1078_v24 = vpop.f32.mrb[9].mxu0 }
 0x1ff   : > { %v1087_v25 = vadd.f32 %v1078_v24, %v996_v20 }
 0x200   : > { %v1167_v26 = vpop.f32.mrb[8].mxu1  ;;  %v1225_v30 = vld [vmem:[%s281_s9 + $0x8] sm:$0xff] (%p1671_p5) }
 0x201   : > { %1375 = vst [vmem:[%s281_s9 + $0x10] sm:$0xff] %v1087_v25  ;;  %v1171_v27 = vadd.f32 %v1167_v26, %v1088_v23  ;;  %v1454_v28 = vpop.f32.mrb[9].mxu1  ;;  %1226 = vst [vmem:[%s1189_s13 + $0x10] sm:$0xff] (%p1671_p5), %v1225_v30 }
 0x203   : > { %1376 = vst [vmem:[%s281_s9 + $0x18] sm:$0xff] %v1171_v27 }
 0x208   : > { %v1227_v31 = vld [vmem:[%s281_s9 + $0x10] sm:$0xff] }
 0x209   : > { %1228 = vst [vmem:[%s1189_s13 + $0x20] sm:$0xff] %v1227_v31 }
 0x20a   : > { %v1229_v32 = vld [vmem:[%s281_s9 + $0x18] sm:$0xff] }
 0x20b   : > { %1230 = vst [vmem:[%s1189_s13 + $0x30] sm:$0xff] %v1229_v32 }
 0x20c PF: > { %s15_s24 = sadd.s32 1, %s1580_s24   ;;  %s1844_s29 = sld [smem:[#allocation4_spill]] }
 0x20d   : > { %p12_p11 = scmp.ge.s32.totalorder %s15_s24, 6   ;;  %s1845_s18 = smov %s1560_s19 }
 0x20e   : > { %s1846_s19 = smov %s1682_s8  ;;  %s1847_s20 = smov %s1572_s22 }
 0x20f   : > { %s1848_s21 = smov %s1576_s23  ;;  %s1849_s22 = smov %s1852_s25 }
 0x210   :  { %14 = sbr.rel (!%p12_p11) target bundleno = 4 (0x4), region = 117 }
 0x212   : > { %s1850_s23 = smov %s1844_s29 }

</bundles_post_ra>
